<compile_context>
chip_gen: v6e
topology: v6e:2x2x1
jax: 0.10.0
libtpu: 0.0.40
codegen_flags: <defaults>
</compile_context>

<pallas_src>
import functools
import math

import jax
import jax.numpy as jnp
from jax import lax
from jax.experimental import pallas as pl
from jax.experimental.pallas import tpu as pltpu


_LANES = 128
_TARGET_TILE_BYTES = 4 * 1024 * 1024   # per input, per grid step


def _sublane(itemsize):
    # Minimum second-minor tile granularity per dtype width.
    return {4: 8, 2: 16, 1: 32}.get(itemsize, 8)


def _bpr_sum_terms(pos_f32, neg_f32, gamma):
    # log(gamma + sigmoid(pos - neg)), with sigmoid in tanh form (2 EUP ops).
    # The negation and the mean are hoisted into the XLA epilogue.
    x = pos_f32 - neg_f32
    s = 0.5 * jnp.tanh(0.5 * x) + 0.5
    return jnp.log(jnp.float32(gamma) + s)


def _bpr_partial_kernel(pos_ref, neg_ref, out_ref, *, gamma, chunk_rows,
                        nchunks, last_chunks, grid):
    """One grid step: fold a (block_rows, 128) tile of log(gamma+sigmoid(p-n))
    into a lane-dense (chunk_rows, 128) f32 partial-sum block.

    No masking: the kernel only ever reads whole valid chunks.  The clamped
    last grid block (if any) just iterates over fewer chunks (static count)."""

    def tile_val(off):
        p = pos_ref[pl.ds(off, chunk_rows), :].astype(jnp.float32)
        n = neg_ref[pl.ds(off, chunk_rows), :].astype(jnp.float32)
        return _bpr_sum_terms(p, n, gamma)

    def accumulate(num_chunks):
        # Two accumulators so the unrolled VPU adds can dual-issue instead of
        # forming one serial add chain.
        zero = jnp.zeros((chunk_rows, _LANES), jnp.float32)
        pairs = num_chunks // 2

        def body(j, accs):
            a0, a1 = accs
            off = pl.multiple_of(2 * j * chunk_rows, chunk_rows)
            a0 = a0 + tile_val(off)
            a1 = a1 + tile_val(off + chunk_rows)
            return (a0, a1)

        a0, a1 = zero, zero
        if pairs > 0:
            a0, a1 = lax.fori_loop(0, pairs, body, (a0, a1),
                                   unroll=max(1, min(4, pairs)))
        if num_chunks % 2:
            off = pl.multiple_of((num_chunks - 1) * chunk_rows, chunk_rows)
            a0 = a0 + tile_val(off)
        return a0 + a1

    if last_chunks == nchunks:
        # Block size divides the kernel rows exactly: single fast path.
        out_ref[...] = accumulate(nchunks)
    else:
        pid = pl.program_id(0)

        @pl.when(pid != grid - 1)
        def _():
            out_ref[...] = accumulate(nchunks)

        @pl.when(pid == grid - 1)
        def _():
            out_ref[...] = accumulate(last_chunks)


def bpr_loss(pos_score, neg_score, gamma=1e-10, block_rows=None):
    """Pallas TPU implementation of BPRLoss.forward.

    Accepts score tensors of any (matching) shape; returns a scalar f32 loss.
    `block_rows` optionally overrides the tile height (testing / tuning).
    """
    assert pos_score.shape == neg_score.shape, "pos/neg score shapes must match"
    dtype = jnp.promote_types(pos_score.dtype, neg_score.dtype)
    if (not jnp.issubdtype(dtype, jnp.floating)) or dtype == jnp.float64:
        dtype = jnp.float32
    pos = pos_score.astype(dtype)
    neg = neg_score.astype(dtype)

    n_elems = math.prod(pos.shape) if pos.shape else 1
    itemsize = jnp.dtype(dtype).itemsize
    sub = _sublane(itemsize)
    chunk_elems = sub * _LANES

    # Flatten (free for contiguous arrays) -> lane-dense (rows, 128) prefix.
    flat_p = pos.reshape(-1)
    flat_n = neg.reshape(-1)
    krows = (n_elems // chunk_elems) * sub       # kernel rows, multiple of sub
    kelems = krows * _LANES

    total = jnp.float32(0.0)

    if krows > 0:
        main_p = flat_p if kelems == n_elems else flat_p[:kelems]
        main_n = flat_n if kelems == n_elems else flat_n[:kelems]
        main_p = main_p.reshape(krows, _LANES)
        main_n = main_n.reshape(krows, _LANES)

        if block_rows is None:
            br = (_TARGET_TILE_BYTES // (_LANES * itemsize)) // sub * sub
        else:
            br = (int(block_rows) // sub) * sub
        br = max(sub, br)
        br = min(br, krows)

        grid = (krows + br - 1) // br
        nchunks = br // sub
        last_rows = krows - (grid - 1) * br      # multiple of sub by construction
        last_chunks = last_rows // sub

        kernel = functools.partial(
            _bpr_partial_kernel, gamma=float(gamma), chunk_rows=sub,
            nchunks=nchunks, last_chunks=last_chunks, grid=grid)

        partials = pl.pallas_call(
            kernel,
            out_shape=jax.ShapeDtypeStruct((grid * sub, _LANES), jnp.float32),
            grid_spec=pltpu.PrefetchScalarGridSpec(
                num_scalar_prefetch=0,
                grid=(grid,),
                in_specs=[
                    pl.BlockSpec((br, _LANES), lambda i: (i, 0)),
                    pl.BlockSpec((br, _LANES), lambda i: (i, 0)),
                ],
                out_specs=pl.BlockSpec((sub, _LANES), lambda i: (i, 0)),
            ),
            compiler_params=pltpu.CompilerParams(
                # Each step writes its own partial-sum block -> no carried
                # state, safe to shard the grid axis across TCs (v7x).
                dimension_semantics=("parallel",),
                vmem_limit_bytes=48 * 1024 * 1024,
            ),
        )(main_p, main_n)
        total = total + jnp.sum(partials, dtype=jnp.float32)

    if kelems != n_elems:
        # Tiny (< sub*128 element) ragged suffix: fold it in with XLA.
        tail_p = flat_p[kelems:].astype(jnp.float32)
        tail_n = flat_n[kelems:].astype(jnp.float32)
        total = total + jnp.sum(_bpr_sum_terms(tail_p, tail_n, float(gamma)),
                                dtype=jnp.float32)

    # Epilogue: mean + hoisted negation.
    return -(total / jnp.float32(n_elems))


def bpr_loss_ref(pos_score, neg_score, gamma=1e-10):
    diff = pos_score.astype(jnp.float32) - neg_score.astype(jnp.float32)
    return jnp.mean(-jnp.log(gamma + jax.nn.sigmoid(diff)))


if __name__ == "__main__":
    key = jax.random.PRNGKey(0)
    keys = jax.random.split(key, 10)

    # Case 1: aligned 2-D scores -> single grid step, no tail.
    pos1 = jax.random.normal(keys[0], (32, 128), dtype=jnp.float32)
    neg1 = jax.random.normal(keys[1], (32, 128), dtype=jnp.float32)
    out1 = bpr_loss(pos1, neg1)
    jax.block_until_ready(out1)
    ref1 = bpr_loss_ref(pos1, neg1)
    assert jnp.allclose(out1, ref1, rtol=1e-5, atol=1e-5), (out1, ref1)

    # Case 2: multi-block grid with a clamped (ragged) last block + XLA tail.
    pos2 = jax.random.normal(keys[2], (100, 384), dtype=jnp.float32)
    neg2 = jax.random.normal(keys[3], (100, 384), dtype=jnp.float32)
    out2 = bpr_loss(pos2, neg2, block_rows=128)
    jax.block_until_ready(out2)
    ref2 = bpr_loss_ref(pos2, neg2)
    assert jnp.allclose(out2, ref2, rtol=1e-5, atol=1e-5), (out2, ref2)

    # Case 3: 1-D f32 scores, misaligned length -> kernel prefix + XLA tail.
    pos3 = jax.random.normal(keys[4], (2500,), dtype=jnp.float32)
    neg3 = jax.random.normal(keys[5], (2500,), dtype=jnp.float32)
    out3 = bpr_loss(pos3, neg3)
    jax.block_until_ready(out3)
    ref3 = bpr_loss_ref(pos3, neg3)
    assert jnp.allclose(out3, ref3, rtol=1e-5, atol=1e-5), (out3, ref3)

    # Case 4: 1-D bf16 scores (typical BPR usage), misaligned length.
    pos4 = jax.random.normal(keys[6], (5000,), dtype=jnp.float32).astype(jnp.bfloat16)
    neg4 = jax.random.normal(keys[7], (5000,), dtype=jnp.float32).astype(jnp.bfloat16)
    out4 = bpr_loss(pos4, neg4)
    jax.block_until_ready(out4)
    ref4 = bpr_loss_ref(pos4, neg4)
    assert jnp.allclose(out4, ref4, rtol=1e-4, atol=1e-4), (out4, ref4)

    # Case 5: tiny input (below one chunk) -> pure XLA fallback path.
    pos5 = jax.random.normal(keys[8], (17,), dtype=jnp.float32)
    neg5 = jax.random.normal(keys[9], (17,), dtype=jnp.float32)
    out5 = bpr_loss(pos5, neg5)
    jax.block_until_ready(out5)
    ref5 = bpr_loss_ref(pos5, neg5)
    assert jnp.allclose(out5, ref5, rtol=1e-5, atol=1e-5), (out5, ref5)

    print("KERNEL_OK")
</pallas_src>

<mosaic_0001>
module attributes {stable_mosaic.version = 11 : i64} {
  func.func @_bpr_partial_kernel(%arg0: i32, %arg1: memref<32x128xf32, #tpu.memory_space<vmem>>, %arg2: memref<32x128xf32, #tpu.memory_space<vmem>>, %arg3: memref<8x128xf32, #tpu.memory_space<vmem>>) attributes {dimension_semantics = [#tpu.dimension_semantics<parallel>], iteration_bounds = array<i64: 1>, scalar_prefetch = 0 : i64, scratch_operands = 0 : i64, tpu.core_type = #tpu.core_type<tc>, window_params = [{transform_indices = @transform_0, window_bounds = array<i64: 32, 128>}, {transform_indices = @transform_1, window_bounds = array<i64: 32, 128>}, {transform_indices = @transform_2, window_bounds = array<i64: 8, 128>}]} {
    %cst = arith.constant 0.000000e+00 : f32
    %0 = vector.broadcast %cst : f32 to vector<8x128xf32>
    %c0_i32 = arith.constant 0 : i32
    %c2_i32 = arith.constant 2 : i32
    %1 = arith.muli %c2_i32, %c0_i32 : i32
    %c8_i32 = arith.constant 8 : i32
    %2 = arith.muli %1, %c8_i32 : i32
    %3 = tpu.assume_multiple %2, 8 : i32
    %4 = arith.index_cast %3 : i32 to index
    %c0 = arith.constant 0 : index
    %5 = vector.load %arg1[%4, %c0] : memref<32x128xf32, #tpu.memory_space<vmem>>, vector<8x128xf32>
    %6 = arith.index_cast %3 : i32 to index
    %c0_0 = arith.constant 0 : index
    %7 = vector.load %arg2[%6, %c0_0] : memref<32x128xf32, #tpu.memory_space<vmem>>, vector<8x128xf32>
    %8 = arith.subf %5, %7 : vector<8x128xf32>
    %cst_1 = arith.constant 5.000000e-01 : f32
    %9 = vector.broadcast %cst_1 : f32 to vector<8x128xf32>
    %10 = arith.mulf %9, %8 : vector<8x128xf32>
    %11 = math.tanh %10 : vector<8x128xf32>
    %cst_2 = arith.constant 5.000000e-01 : f32
    %12 = vector.broadcast %cst_2 : f32 to vector<8x128xf32>
    %13 = arith.mulf %12, %11 : vector<8x128xf32>
    %cst_3 = arith.constant 5.000000e-01 : f32
    %14 = vector.broadcast %cst_3 : f32 to vector<8x128xf32>
    %15 = arith.addf %13, %14 : vector<8x128xf32>
    %cst_4 = arith.constant 1.000000e-10 : f32
    %16 = vector.broadcast %cst_4 : f32 to vector<8x128xf32>
    %17 = arith.addf %16, %15 : vector<8x128xf32>
    %18 = math.log %17 : vector<8x128xf32>
    %19 = arith.addf %0, %18 : vector<8x128xf32>
    %c8_i32_5 = arith.constant 8 : i32
    %20 = arith.addi %3, %c8_i32_5 : i32
    %21 = arith.index_cast %20 : i32 to index
    %c0_6 = arith.constant 0 : index
    %22 = vector.load %arg1[%21, %c0_6] : memref<32x128xf32, #tpu.memory_space<vmem>>, vector<8x128xf32>
    %23 = arith.index_cast %20 : i32 to index
    %c0_7 = arith.constant 0 : index
    %24 = vector.load %arg2[%23, %c0_7] : memref<32x128xf32, #tpu.memory_space<vmem>>, vector<8x128xf32>
    %25 = arith.subf %22, %24 : vector<8x128xf32>
    %cst_8 = arith.constant 5.000000e-01 : f32
    %26 = vector.broadcast %cst_8 : f32 to vector<8x128xf32>
    %27 = arith.mulf %26, %25 : vector<8x128xf32>
    %28 = math.tanh %27 : vector<8x128xf32>
    %cst_9 = arith.constant 5.000000e-01 : f32
    %29 = vector.broadcast %cst_9 : f32 to vector<8x128xf32>
    %30 = arith.mulf %29, %28 : vector<8x128xf32>
    %cst_10 = arith.constant 5.000000e-01 : f32
    %31 = vector.broadcast %cst_10 : f32 to vector<8x128xf32>
    %32 = arith.addf %30, %31 : vector<8x128xf32>
    %cst_11 = arith.constant 1.000000e-10 : f32
    %33 = vector.broadcast %cst_11 : f32 to vector<8x128xf32>
    %34 = arith.addf %33, %32 : vector<8x128xf32>
    %35 = math.log %34 : vector<8x128xf32>
    %36 = arith.addf %0, %35 : vector<8x128xf32>
    %c1_i32 = arith.constant 1 : i32
    %c2_i32_12 = arith.constant 2 : i32
    %37 = arith.muli %c2_i32_12, %c1_i32 : i32
    %c8_i32_13 = arith.constant 8 : i32
    %38 = arith.muli %37, %c8_i32_13 : i32
    %39 = tpu.assume_multiple %38, 8 : i32
    %40 = arith.index_cast %39 : i32 to index
    %c0_14 = arith.constant 0 : index
    %41 = vector.load %arg1[%40, %c0_14] : memref<32x128xf32, #tpu.memory_space<vmem>>, vector<8x128xf32>
    %42 = arith.index_cast %39 : i32 to index
    %c0_15 = arith.constant 0 : index
    %43 = vector.load %arg2[%42, %c0_15] : memref<32x128xf32, #tpu.memory_space<vmem>>, vector<8x128xf32>
    %44 = arith.subf %41, %43 : vector<8x128xf32>
    %cst_16 = arith.constant 5.000000e-01 : f32
    %45 = vector.broadcast %cst_16 : f32 to vector<8x128xf32>
    %46 = arith.mulf %45, %44 : vector<8x128xf32>
    %47 = math.tanh %46 : vector<8x128xf32>
    %cst_17 = arith.constant 5.000000e-01 : f32
    %48 = vector.broadcast %cst_17 : f32 to vector<8x128xf32>
    %49 = arith.mulf %48, %47 : vector<8x128xf32>
    %cst_18 = arith.constant 5.000000e-01 : f32
    %50 = vector.broadcast %cst_18 : f32 to vector<8x128xf32>
    %51 = arith.addf %49, %50 : vector<8x128xf32>
    %cst_19 = arith.constant 1.000000e-10 : f32
    %52 = vector.broadcast %cst_19 : f32 to vector<8x128xf32>
    %53 = arith.addf %52, %51 : vector<8x128xf32>
    %54 = math.log %53 : vector<8x128xf32>
    %55 = arith.addf %19, %54 : vector<8x128xf32>
    %c8_i32_20 = arith.constant 8 : i32
    %56 = arith.addi %39, %c8_i32_20 : i32
    %57 = arith.index_cast %56 : i32 to index
    %c0_21 = arith.constant 0 : index
    %58 = vector.load %arg1[%57, %c0_21] : memref<32x128xf32, #tpu.memory_space<vmem>>, vector<8x128xf32>
    %59 = arith.index_cast %56 : i32 to index
    %c0_22 = arith.constant 0 : index
    %60 = vector.load %arg2[%59, %c0_22] : memref<32x128xf32, #tpu.memory_space<vmem>>, vector<8x128xf32>
    %61 = arith.subf %58, %60 : vector<8x128xf32>
    %cst_23 = arith.constant 5.000000e-01 : f32
    %62 = vector.broadcast %cst_23 : f32 to vector<8x128xf32>
    %63 = arith.mulf %62, %61 : vector<8x128xf32>
    %64 = math.tanh %63 : vector<8x128xf32>
    %cst_24 = arith.constant 5.000000e-01 : f32
    %65 = vector.broadcast %cst_24 : f32 to vector<8x128xf32>
    %66 = arith.mulf %65, %64 : vector<8x128xf32>
    %cst_25 = arith.constant 5.000000e-01 : f32
    %67 = vector.broadcast %cst_25 : f32 to vector<8x128xf32>
    %68 = arith.addf %66, %67 : vector<8x128xf32>
    %cst_26 = arith.constant 1.000000e-10 : f32
    %69 = vector.broadcast %cst_26 : f32 to vector<8x128xf32>
    %70 = arith.addf %69, %68 : vector<8x128xf32>
    %71 = math.log %70 : vector<8x128xf32>
    %72 = arith.addf %36, %71 : vector<8x128xf32>
    %c2_i32_27 = arith.constant 2 : i32
    %73 = arith.addf %55, %72 : vector<8x128xf32>
    %c0_28 = arith.constant 0 : index
    %c0_29 = arith.constant 0 : index
    %74 = vector.load %arg3[%c0_28, %c0_29] : memref<8x128xf32, #tpu.memory_space<vmem>>, vector<8x128xf32>
    tpu.vector_store %arg3[%c0_28, %c0_29], %73 {strides = array<i32>} : memref<8x128xf32, #tpu.memory_space<vmem>>, vector<8x128xf32>,
    return
  }
  func.func @transform_0(%arg0: i32) -> (i32, i32) {
    %c0_i32 = arith.constant 0 : i32
    %c0_i32_0 = arith.constant 0 : i32
    return %arg0, %c0_i32 : i32, i32
  }
  func.func @transform_1(%arg0: i32) -> (i32, i32) {
    %c0_i32 = arith.constant 0 : i32
    %c0_i32_0 = arith.constant 0 : i32
    return %arg0, %c0_i32 : i32, i32
  }
  func.func @transform_2(%arg0: i32) -> (i32, i32) {
    %c0_i32 = arith.constant 0 : i32
    %c0_i32_0 = arith.constant 0 : i32
    return %arg0, %c0_i32 : i32, i32
  }
}

</mosaic_0001>

<bundles_post_ra>
// kernel: tpu_custom_call.1
= control target key start
LH: loop header
LB: loop body
LE: loop exit
PB: predicated region body
PF: predicated region fallthrough
CT: control target
= control target key end

     0   :  { %7 = vsyncpa [#allocation3], 0  ;;  %s230_s0 = inlined_call_operand.hbm [shape: f32[32,128], index: 0, kind: input, shape index: {}]   ;;  %s231_s1 = inlined_call_operand.hbm [shape: f32[32,128], index: 1, kind: input, shape index: {}]   ;;  %s232_s2 = inlined_call_operand.hbm [shape: f32[8,128], index: 2, kind: output, shape index: {}]  }
   0x1   :  { %8 = vsyncpa [#allocation6], 0 }
   0x2   :  { %9 = vsyncpa [#allocation4], 0  ;;  %s201_s9 = smov [#allocation2]  }
   0x3   :  { %s15_s10 = sshll.u32 %s201_s9, 4  ;;  %s16_s10 = int_to_ptr.vmem [resolvable:$true] %s15_s10 }
   0x4   :  { %s143_s11 = scalar_lea.vmem %s16_s10, 512  ;;  %p148_p1 = scmp.lt.s32.totalorder %s16_s10, %s16_s10 }
   0x5   :  { %p144_p0 = scmp.ne.s32.totalorder %s16_s10, %s143_s11  ;;  %p149_p2 = scmp.lt.s32.totalorder %s143_s11, %s143_s11 }
   0x7   :  { %p150_p3 = por %p149_p2, %p148_p1 }
   0x9   :  { %p151_p4 = pnand %p150_p3, %p144_p0 }
   0xb   :  { %154 = shalt.err (!%p151_p4)
}
   0xc   :  { %s202_s12 = smov 128   ;;  %s203_s13 = smov 8  }
   0xd   :  { %21 = dma.hbm_to_vmem [thread:$0]  %s230_s0, 512, %s16_s10, [#allocation3], %s202_s12, %s202_s12, %s203_s13  }
   0xe   :  { %s204_s16 = smov [#allocation5]  }
   0xf   :  { %s27_s17 = sshll.u32 %s204_s16, 4  ;;  %s28_s17 = int_to_ptr.vmem [resolvable:$true] %s27_s17 }
  0x10   :  { %s163_s18 = scalar_lea.vmem %s28_s17, 512  ;;  %p168_p6 = scmp.lt.s32.totalorder %s28_s17, %s28_s17 }
  0x11   :  { %p164_p5 = scmp.ne.s32.totalorder %s28_s17, %s163_s18  ;;  %p169_p7 = scmp.lt.s32.totalorder %s163_s18, %s163_s18 }
  0x13   :  { %p170_p8 = por %p169_p7, %p168_p6 }
  0x15   :  { %p171_p9 = pnand %p170_p8, %p164_p5 }
  0x17   :  { %174 = shalt.err (!%p171_p9)
}
  0x18   :  { %33 = dma.hbm_to_vmem [thread:$0]  %s231_s1, 512, %s28_s17, [#allocation6], %s202_s12, %s202_s12, %s203_s13  }
  0x19   :  { %195 = dma.done.wait [#allocation3], 512  }
  0x1a   :  { %196 = vsyncadd [#allocation3], 4294966784 }
  0x1b   :  { %197 = dma.done.wait [#allocation6], 512  }
  0x1c   :  { %198 = vsyncadd [#allocation6], 4294966784  ;;  %v40_v0 = vld [vmem:[#allocation2] sm:$0xff]  ;;  %v53_v2 = vld [vmem:[#allocation2 + $0x8] sm:$0xff]  ;;  %s205_s0 = smov [#allocation7]  }
  0x1d   :  { %v41_v1 = vld [vmem:[#allocation5] sm:$0xff]  ;;  %v55_v4 = vld [vmem:[#allocation5 + $0x8] sm:$0xff]  ;;  %v66_v5 = vld [vmem:[#allocation2 + $0x10] sm:$0xff]  ;;  %s100_s1 = sshll.u32 %s205_s0, 4  ;;  %s101_s1 = int_to_ptr.vmem [resolvable:$true] %s100_s1 }
  0x1e   :  { %v42_v3 = vsub.f32 %v40_v0, %v41_v1  ;;  %v68_v6 = vld [vmem:[#allocation5 + $0x10] sm:$0xff]  ;;  %v56_v7 = vsub.f32 %v53_v2, %v55_v4  ;;  %v80_v9 = vld [vmem:[#allocation2 + $0x18] sm:$0xff]  ;;  %s175_s21 = scalar_lea.vmem %s101_s1, 128  ;;  %p180_p11 = scmp.lt.s32.totalorder %s101_s1, %s101_s1 }
  0x1f   :  { %v69_v8 = vsub.f32 %v66_v5, %v68_v6  ;;  %v82_v10 = vld [vmem:[#allocation5 + $0x18] sm:$0xff]  ;;  %p176_p10 = scmp.ne.s32.totalorder %s101_s1, %s175_s21  ;;  %p181_p12 = scmp.lt.s32.totalorder %s175_s21, %s175_s21 }
  0x20   :  { %v43_v11 = vmul.f32 0.5, %v42_v3  ;;  %v83_v12 = vsub.f32 %v80_v9, %v82_v10  ;;  %v57_v13 = vmul.f32 0.5, %v56_v7 }
  0x21   :  { %v70_v14 = vmul.f32 0.5, %v69_v8  ;;  %p182_p13 = por %p181_p12, %p180_p11 }
  0x22   :  { %119 = vtanh.f32 %v43_v11  ;;  %v84_v15 = vmul.f32 0.5, %v83_v12 }
  0x23   :  { %121 = vtanh.f32 %v57_v13  ;;  %p183_p0 = pnand %p182_p13, %p176_p10 }
  0x24   :  { %123 = vtanh.f32 %v70_v14 }
  0x25   :  { %125 = vtanh.f32 %v84_v15 }
  0x2f   :  { %v120_v16 = vpop.eup %119 }
  0x30   :  { %v122_v17 = vpop.eup %121  ;;  %v45_v18 = vmul.f32 0.5, %v120_v16 }
  0x31   :  { %v124_v19 = vpop.eup %123  ;;  %v59_v20 = vmul.f32 0.5, %v122_v17 }
  0x32   :  { %v126_v21 = vpop.eup %125  ;;  %v46_v22 = vadd.f32 0.5, %v45_v18  ;;  %v72_v23 = vmul.f32 0.5, %v124_v19 }
  0x33   :  { %v60_v24 = vadd.f32 0.5, %v59_v20  ;;  %v86_v25 = vmul.f32 0.5, %v126_v21 }
  0x34   :  { %v47_v26 = vadd.f32 1e-10, %v46_v22  ;;  %v73_v27 = vadd.f32 0.5, %v72_v23 }
  0x35   :  { %v61_v28 = vadd.f32 1e-10, %v60_v24  ;;  %v87_v29 = vadd.f32 0.5, %v86_v25 }
  0x36   :  { %127 = vlog2.f32 %v47_v26  ;;  %v74_v30 = vadd.f32 1e-10, %v73_v27 }
  0x37   :  { %129 = vlog2.f32 %v61_v28  ;;  %v88_v31 = vadd.f32 1e-10, %v87_v29 }
  0x38   :  { %131 = vlog2.f32 %v74_v30 }
  0x39   :  { %133 = vlog2.f32 %v88_v31 }
  0x43   :  { %v128_v32 = vpop.eup %127 }
  0x44   :  { %v130_v33 = vpop.eup %129  ;;  %v49_v34 = vmul.f32 0.6931472, %v128_v32 }
  0x45   :  { %v132_v35 = vpop.eup %131  ;;  %v63_v36 = vmul.f32 0.6931472, %v130_v33 }
  0x46   :  { %v134_v37 = vpop.eup %133  ;;  %v76_v38 = vmul.f32 0.6931472, %v132_v35 }
  0x47   :  { %v90_v39 = vmul.f32 0.6931472, %v134_v37 }
  0x48   :  { %v77_v40 = vadd.f32 %v76_v38, %v49_v34 }
  0x49   :  { %v91_v41 = vadd.f32 %v90_v39, %v63_v36 }
  0x4b   :  { %v92_v42 = vadd.f32 %v91_v41, %v77_v40 }
  0x4d   :  { %93 = vst [vmem:[#allocation7] sm:$0xff] %v92_v42 }
  0x4e   :  { %186 = shalt.err (!%p183_p0)
}
  0x4f   :  { %103 = dma.vmem_to_hbm [thread:$0]  %s101_s1, 128, %s232_s2, [#allocation4]  }
  0x50   :  { %199 = dma.done.wait [#allocation4], 128  }
  0x51   :  { %200 = vsyncadd [#allocation4], 4294967168 }
  0x52   :  { %107 = vsyncpa [#allocation3], 1 }
  0x53   :  { %108 = vsyncpa [#allocation6], 1 }
  0x54   :  { %109 = vsyncpa [#allocation4], 1 }

</bundles_post_ra>
